<compile_context>
chip_gen: v6e
topology: v6e:2x2x1
jax: 0.10.0
libtpu: 0.0.40
codegen_flags: <defaults>
</compile_context>

<pallas_src>
import functools

import jax
import jax.numpy as jnp
import numpy as np
from jax.experimental import pallas as pl
from jax.experimental.pallas import tpu as pltpu


_ALIGN = 16                    # bf16 sublane packing => 16-row tile alignment (ok for f32 too)
_VMEM_BUDGET = 40 * 1024 * 1024  # working-set target that fits every generation with headroom


def _round_up(x, m):
    return ((x + m - 1) // m) * m


def _cdiv(a, b):
    return -(-a // b)


def _edge_predictor_kernel(src_ref, dst_ref, w_src_ref, b_src_ref,
                           w_dst_ref, b_dst_ref, w_out_ref, b_out_ref,
                           out_ref, src_proj_ref):
    # src_ref:      (tile_e, D)  streamed src rows (bf16), resident across the j axis
    # dst_ref:      (tile_e, D)  streamed dst rows (positive if j == 0, else neg j-1)
    # w_src_ref/w_dst_ref: (D, D) transposed Linear weights (bf16), single VMEM copy
    # b_src_ref/b_dst_ref: (1, D) f32;  w_out_ref: (1, D) f32;  b_out_ref: (1, 1) f32
    # out_ref:      (tile_e, 1) f32
    # src_proj_ref: (tile_e, D) f32 VMEM scratch holding src_fc(src_tile) + b_src + b_dst
    j = pl.program_id(1)

    @pl.when(j == 0)
    def _():
        # src_fc computed once per edge tile and reused for pos + every neg sample.
        # Both biases are folded in here so the per-step path has no broadcast-add.
        src_proj_ref[...] = (
            jnp.dot(src_ref[...], w_src_ref[...],
                    preferred_element_type=jnp.float32)
            + b_src_ref[...] + b_dst_ref[...])

    # dst_fc for this (pos or neg) slice -- MXU, f32 accumulate.
    dst_proj = jnp.dot(dst_ref[...], w_dst_ref[...],
                       preferred_element_type=jnp.float32)

    edge = jnp.maximum(src_proj_ref[...] + dst_proj, 0.0)

    # out_fc: Linear(D, 1) as broadcast-mul (VPU) + lane reduce (XLU); an N=1 MXU
    # matmul would waste the systolic array.
    score = jnp.sum(edge * w_out_ref[...], axis=-1, keepdims=True)
    out_ref[...] = score + b_out_ref[...]


def _plan_tiles(num_edge, dim, act_bytes, block_rows):
    """Balanced edge tiles + explicit VMEM budget.

    n_tiles >= 2 so the 'parallel' i axis can shard across v7x's two TensorCores
    (harmless on single-TC v5e/v6e); tile_e is sized so ne_pad ~= num_edge.
    """
    n_tiles = max(2, _cdiv(num_edge, block_rows))
    tile_e = min(_round_up(_cdiv(num_edge, n_tiles), _ALIGN),
                 _round_up(num_edge, _ALIGN))

    def est(te):
        src = 2 * te * dim * act_bytes       # double-buffered src tile
        dst = 2 * te * dim * act_bytes       # double-buffered dst tile
        wts = 2 * dim * dim * act_bytes      # single resident copy of W_src^T + W_dst^T
        small = 3 * dim * 4 + 4              # biases / w_out / b_out (single copies)
        scratch = te * dim * 4               # f32 src_proj scratch
        out = 2 * te * 4                     # double-buffered (tile_e, 1) f32 output
        return src + dst + wts + small + scratch + out

    while tile_e > _ALIGN and est(tile_e) > _VMEM_BUDGET:
        tile_e = _round_up(tile_e // 2, _ALIGN)

    vmem_limit = int(min(64 * 1024 * 1024,
                         max(32 * 1024 * 1024, 2 * est(tile_e))))
    return tile_e, vmem_limit


@functools.partial(jax.jit,
                   static_argnames=("neg_samples", "block_rows", "act_dtype"))
def edge_predictor(h, w_src, b_src, w_dst, b_dst, w_out, b_out,
                   neg_samples=1, block_rows=1024, act_dtype=jnp.bfloat16):
    """Pallas EdgePredictor forward.

    h:            (num_edge*(neg_samples+2), D) node embeddings.
    w_src/w_dst:  (D, D) PyTorch-layout Linear weights (out, in).
    b_src/b_dst:  (D,);  w_out: (1, D);  b_out: (1,)
    act_dtype:    dtype the streamed activations / (D, D) weights enter the MXU in
                  (default bf16 -- halves HBM traffic; accumulation stays f32).
    Returns (pos_scores (num_edge, 1), neg_scores (num_edge*neg_samples, 1)), float32.
    """
    total, dim = h.shape
    num_edge = total // (neg_samples + 2)
    act_bytes = np.dtype(act_dtype).itemsize

    # Streamed operands in the (typically bf16) compute dtype.
    h_src = h[:num_edge].astype(act_dtype)
    # Free reshape of the contiguous tail: slot 0 = positive dst, slots 1.. = neg dst.
    h_dst = h[num_edge:num_edge * (neg_samples + 2)].astype(act_dtype).reshape(
        neg_samples + 1, num_edge, dim)

    tile_e, vmem_limit = _plan_tiles(num_edge, dim, act_bytes, block_rows)
    ne_pad = _round_up(num_edge, tile_e)
    if ne_pad != num_edge:
        h_src = jnp.pad(h_src, ((0, ne_pad - num_edge), (0, 0)))
        h_dst = jnp.pad(h_dst, ((0, 0), (0, ne_pad - num_edge), (0, 0)))

    # PyTorch Linear stores weight as (out, in); kernel computes x @ W^T.
    w_src_t = w_src.T.astype(act_dtype)
    w_dst_t = w_dst.T.astype(act_dtype)
    b_src_r = b_src.reshape(1, dim).astype(jnp.float32)
    b_dst_r = b_dst.reshape(1, dim).astype(jnp.float32)
    w_out_r = w_out.reshape(1, dim).astype(jnp.float32)
    b_out_r = b_out.reshape(1, 1).astype(jnp.float32)

    grid = (ne_pad // tile_e, neg_samples + 1)

    # Constant operands: whole-array, single resident VMEM copy (no double-buffering).
    const_spec = pl.BlockSpec(memory_space=pltpu.MemorySpace.VMEM)

    out = pl.pallas_call(
        _edge_predictor_kernel,
        out_shape=jax.ShapeDtypeStruct((neg_samples + 1, ne_pad, 1), jnp.float32),
        grid_spec=pltpu.PrefetchScalarGridSpec(
            num_scalar_prefetch=0,
            grid=grid,
            in_specs=[
                pl.BlockSpec((tile_e, dim), lambda i, j: (i, 0)),           # src rows
                pl.BlockSpec((None, tile_e, dim), lambda i, j: (j, i, 0)),  # dst rows
                const_spec,   # W_src^T  (D, D)
                const_spec,   # b_src    (1, D)
                const_spec,   # W_dst^T  (D, D)
                const_spec,   # b_dst    (1, D)
                const_spec,   # w_out    (1, D)
                const_spec,   # b_out    (1, 1)
            ],
            out_specs=pl.BlockSpec((None, tile_e, 1), lambda i, j: (j, i, 0)),
            scratch_shapes=[pltpu.VMEM((tile_e, dim), jnp.float32)],
        ),
        compiler_params=pltpu.CompilerParams(
            dimension_semantics=("parallel", "arbitrary"),
            vmem_limit_bytes=vmem_limit,
        ),
    )(h_src, h_dst, w_src_t, b_src_r, w_dst_t, b_dst_r, w_out_r, b_out_r)

    pos = out[0, :num_edge, :]
    neg = out[1:, :num_edge, :].reshape(neg_samples * num_edge, 1)
    return pos, neg


def edge_predictor_ref(h, w_src, b_src, w_dst, b_dst, w_out, b_out, neg_samples=1):
    """Plain-JAX f32 reference with the exact PyTorch semantics."""
    num_edge = h.shape[0] // (neg_samples + 2)
    h_s = h[:num_edge] @ w_src.T + b_src
    h_pd = h[num_edge:2 * num_edge] @ w_dst.T + b_dst
    h_nd = h[2 * num_edge:num_edge * (neg_samples + 2)] @ w_dst.T + b_dst
    h_pos_edge = jnp.maximum(h_s + h_pd, 0.0)
    h_neg_edge = jnp.maximum(jnp.tile(h_s, (neg_samples, 1)) + h_nd, 0.0)
    return h_pos_edge @ w_out.T + b_out, h_neg_edge @ w_out.T + b_out


if __name__ == "__main__":
    dim_in = 32
    num_edge = 16
    neg_samples = 1

    key = jax.random.PRNGKey(0)
    k_h, k_ws, k_bs, k_wd, k_bd, k_wo, k_bo = jax.random.split(key, 7)

    h = jax.random.normal(k_h, (num_edge * (neg_samples + 2), dim_in), jnp.float32)
    bound = 1.0 / np.sqrt(dim_in)
    w_src = jax.random.uniform(k_ws, (dim_in, dim_in), jnp.float32, -bound, bound)
    b_src = jax.random.uniform(k_bs, (dim_in,), jnp.float32, -bound, bound)
    w_dst = jax.random.uniform(k_wd, (dim_in, dim_in), jnp.float32, -bound, bound)
    b_dst = jax.random.uniform(k_bd, (dim_in,), jnp.float32, -bound, bound)
    w_out = jax.random.uniform(k_wo, (1, dim_in), jnp.float32, -bound, bound)
    b_out = jax.random.uniform(k_bo, (1,), jnp.float32, -bound, bound)

    pos_ref, neg_ref = edge_predictor_ref(h, w_src, b_src, w_dst, b_dst, w_out, b_out,
                                          neg_samples=neg_samples)

    # Default (production) path: bf16-streamed activations/weights, f32 accumulation.
    pos, neg = edge_predictor(h, w_src, b_src, w_dst, b_dst, w_out, b_out,
                              neg_samples=neg_samples)
    pos, neg = jax.block_until_ready((pos, neg))
    assert pos.shape == (num_edge, 1), pos.shape
    assert neg.shape == (num_edge * neg_samples, 1), neg.shape
    np.testing.assert_allclose(np.asarray(pos), np.asarray(pos_ref), rtol=1e-2, atol=1e-2)
    np.testing.assert_allclose(np.asarray(neg), np.asarray(neg_ref), rtol=1e-2, atol=1e-2)

    # Exact f32 path (same kernel) for a tight numerical check.
    pos32, neg32 = edge_predictor(h, w_src, b_src, w_dst, b_dst, w_out, b_out,
                                  neg_samples=neg_samples, act_dtype=jnp.float32)
    pos32, neg32 = jax.block_until_ready((pos32, neg32))
    np.testing.assert_allclose(np.asarray(pos32), np.asarray(pos_ref), rtol=2e-3, atol=2e-3)
    np.testing.assert_allclose(np.asarray(neg32), np.asarray(neg_ref), rtol=2e-3, atol=2e-3)

    print("KERNEL_OK")
</pallas_src>

<mosaic_0001>
module attributes {stable_mosaic.version = 11 : i64} {
  func.func @_edge_predictor_kernel(%arg0: i32, %arg1: i32, %arg2: memref<16x32xbf16, #tpu.memory_space<vmem>>, %arg3: memref<1x16x32xbf16, #tpu.memory_space<vmem>>, %arg4: memref<32x32xbf16, #tpu.memory_space<vmem>>, %arg5: memref<1x32xf32, #tpu.memory_space<vmem>>, %arg6: memref<32x32xbf16, #tpu.memory_space<vmem>>, %arg7: memref<1x32xf32, #tpu.memory_space<vmem>>, %arg8: memref<1x32xf32, #tpu.memory_space<vmem>>, %arg9: memref<1x1xf32, #tpu.memory_space<vmem>>, %arg10: memref<1x16x1xf32, #tpu.memory_space<vmem>>, %arg11: memref<16x32xf32, #tpu.memory_space<vmem>>) attributes {dimension_semantics = [#tpu.dimension_semantics<parallel>, #tpu.dimension_semantics<arbitrary>], iteration_bounds = array<i64: 1, 2>, scalar_prefetch = 0 : i64, scratch_operands = 1 : i64, tpu.core_type = #tpu.core_type<tc>, window_params = [{transform_indices = @transform_0, window_bounds = array<i64: 16, 32>}, {transform_indices = @transform_1, window_bounds = array<i64: 1, 16, 32>}, {pipeline_mode = #tpu.pipeline_mode<synchronous>, transform_indices = @transform_2, window_bounds = array<i64: 32, 32>}, {pipeline_mode = #tpu.pipeline_mode<synchronous>, transform_indices = @transform_3, window_bounds = array<i64: 1, 32>}, {pipeline_mode = #tpu.pipeline_mode<synchronous>, transform_indices = @transform_4, window_bounds = array<i64: 32, 32>}, {pipeline_mode = #tpu.pipeline_mode<synchronous>, transform_indices = @transform_5, window_bounds = array<i64: 1, 32>}, {pipeline_mode = #tpu.pipeline_mode<synchronous>, transform_indices = @transform_6, window_bounds = array<i64: 1, 32>}, {pipeline_mode = #tpu.pipeline_mode<synchronous>, transform_indices = @transform_7, window_bounds = array<i64: 1, 1>}, {transform_indices = @transform_8, window_bounds = array<i64: 1, 16, 1>}]} {
    %c0_i32 = arith.constant 0 : i32
    %0 = arith.cmpi eq, %arg1, %c0_i32 : i32
    %1 = arith.extui %0 : i1 to i32
    %c0_i32_0 = arith.constant 0 : i32
    %2 = arith.cmpi ne, %1, %c0_i32_0 : i32
    scf.if %2 {
      %c0_16 = arith.constant 0 : index
      %c0_17 = arith.constant 0 : index
      %22 = vector.load %arg2[%c0_16, %c0_17] : memref<16x32xbf16, #tpu.memory_space<vmem>>, vector<16x32xbf16>
      %c0_18 = arith.constant 0 : index
      %c0_19 = arith.constant 0 : index
      %23 = vector.load %arg4[%c0_18, %c0_19] : memref<32x32xbf16, #tpu.memory_space<vmem>>, vector<32x32xbf16>
      %cst_20 = arith.constant dense<0.000000e+00> : vector<16x32xf32>
      %24 = tpu.matmul %22, %23, %cst_20 {dimension_numbers = #tpu.dot_dimension_numbers<[1], [0], [0], [1], [0, 0, 1, 1], [], []>} : vector<16x32xbf16>, vector<32x32xbf16>, vector<16x32xf32> -> vector<16x32xf32>
      %c0_21 = arith.constant 0 : index
      %c0_22 = arith.constant 0 : index
      %25 = vector.load %arg5[%c0_21, %c0_22] : memref<1x32xf32, #tpu.memory_space<vmem>>, vector<1x32xf32>
      %26 = vector.broadcast %25 : vector<1x32xf32> to vector<16x32xf32>
      %27 = arith.addf %24, %26 : vector<16x32xf32>
      %c0_23 = arith.constant 0 : index
      %c0_24 = arith.constant 0 : index
      %28 = vector.load %arg7[%c0_23, %c0_24] : memref<1x32xf32, #tpu.memory_space<vmem>>, vector<1x32xf32>
      %29 = vector.broadcast %28 : vector<1x32xf32> to vector<16x32xf32>
      %30 = arith.addf %27, %29 : vector<16x32xf32>
      %c0_25 = arith.constant 0 : index
      %c0_26 = arith.constant 0 : index
      %31 = vector.load %arg11[%c0_25, %c0_26] : memref<16x32xf32, #tpu.memory_space<vmem>>, vector<16x32xf32>
      tpu.vector_store %arg11[%c0_25, %c0_26], %30 {strides = array<i32>} : memref<16x32xf32, #tpu.memory_space<vmem>>, vector<16x32xf32>,
    } else {
    }
    %c0 = arith.constant 0 : index
    %c0_1 = arith.constant 0 : index
    %c0_2 = arith.constant 0 : index
    %3 = vector.load %arg3[%c0, %c0_1, %c0_2] : memref<1x16x32xbf16, #tpu.memory_space<vmem>>, vector<1x16x32xbf16>
    %4 = vector.shape_cast %3 : vector<1x16x32xbf16> to vector<16x32xbf16>
    %c0_3 = arith.constant 0 : index
    %c0_4 = arith.constant 0 : index
    %5 = vector.load %arg6[%c0_3, %c0_4] : memref<32x32xbf16, #tpu.memory_space<vmem>>, vector<32x32xbf16>
    %cst = arith.constant dense<0.000000e+00> : vector<16x32xf32>
    %6 = tpu.matmul %4, %5, %cst {dimension_numbers = #tpu.dot_dimension_numbers<[1], [0], [0], [1], [0, 0, 1, 1], [], []>} : vector<16x32xbf16>, vector<32x32xbf16>, vector<16x32xf32> -> vector<16x32xf32>
    %c0_5 = arith.constant 0 : index
    %c0_6 = arith.constant 0 : index
    %7 = vector.load %arg11[%c0_5, %c0_6] : memref<16x32xf32, #tpu.memory_space<vmem>>, vector<16x32xf32>
    %8 = arith.addf %7, %6 : vector<16x32xf32>
    %cst_7 = arith.constant 0.000000e+00 : f32
    %9 = vector.broadcast %cst_7 : f32 to vector<16x32xf32>
    %10 = arith.maximumf %8, %9 : vector<16x32xf32>
    %c0_8 = arith.constant 0 : index
    %c0_9 = arith.constant 0 : index
    %11 = vector.load %arg8[%c0_8, %c0_9] : memref<1x32xf32, #tpu.memory_space<vmem>>, vector<1x32xf32>
    %12 = vector.broadcast %11 : vector<1x32xf32> to vector<16x32xf32>
    %13 = arith.mulf %10, %12 : vector<16x32xf32>
    %cst_10 = arith.constant dense<0.000000e+00> : vector<16xf32>
    %14 = vector.multi_reduction <add>, %13, %cst_10 [1] : vector<16x32xf32> to vector<16xf32>
    %15 = vector.shape_cast %14 : vector<16xf32> to vector<16x1xf32>
    %c0_11 = arith.constant 0 : index
    %c0_12 = arith.constant 0 : index
    %16 = vector.load %arg9[%c0_11, %c0_12] : memref<1x1xf32, #tpu.memory_space<vmem>>, vector<1x1xf32>
    %17 = vector.broadcast %16 : vector<1x1xf32> to vector<16x1xf32>
    %18 = arith.addf %15, %17 : vector<16x1xf32>
    %c0_13 = arith.constant 0 : index
    %c0_14 = arith.constant 0 : index
    %c0_15 = arith.constant 0 : index
    %19 = vector.load %arg10[%c0_13, %c0_14, %c0_15] : memref<1x16x1xf32, #tpu.memory_space<vmem>>, vector<1x16x1xf32>
    %20 = vector.shape_cast %19 : vector<1x16x1xf32> to vector<16x1xf32>
    %21 = vector.shape_cast %18 : vector<16x1xf32> to vector<1x16x1xf32>
    tpu.vector_store %arg10[%c0_13, %c0_14, %c0_15], %21 {strides = array<i32>} : memref<1x16x1xf32, #tpu.memory_space<vmem>>, vector<1x16x1xf32>,
    return
  }
  func.func @transform_0(%arg0: i32, %arg1: i32) -> (i32, i32) {
    %c0_i32 = arith.constant 0 : i32
    %c0_i32_0 = arith.constant 0 : i32
    return %arg0, %c0_i32 : i32, i32
  }
  func.func @transform_1(%arg0: i32, %arg1: i32) -> (i32, i32, i32) {
    %c0_i32 = arith.constant 0 : i32
    %c0_i32_0 = arith.constant 0 : i32
    return %arg1, %arg0, %c0_i32 : i32, i32, i32
  }
  func.func @transform_2(%arg0: i32, %arg1: i32) -> (i32, i32) {
    %c0_i32 = arith.constant 0 : i32
    %c0_i32_0 = arith.constant 0 : i32
    %c0_i32_1 = arith.constant 0 : i32
    return %c0_i32, %c0_i32_0 : i32, i32
  }
  func.func @transform_3(%arg0: i32, %arg1: i32) -> (i32, i32) {
    %c0_i32 = arith.constant 0 : i32
    %c0_i32_0 = arith.constant 0 : i32
    %c0_i32_1 = arith.constant 0 : i32
    return %c0_i32, %c0_i32_0 : i32, i32
  }
  func.func @transform_4(%arg0: i32, %arg1: i32) -> (i32, i32) {
    %c0_i32 = arith.constant 0 : i32
    %c0_i32_0 = arith.constant 0 : i32
    %c0_i32_1 = arith.constant 0 : i32
    return %c0_i32, %c0_i32_0 : i32, i32
  }
  func.func @transform_5(%arg0: i32, %arg1: i32) -> (i32, i32) {
    %c0_i32 = arith.constant 0 : i32
    %c0_i32_0 = arith.constant 0 : i32
    %c0_i32_1 = arith.constant 0 : i32
    return %c0_i32, %c0_i32_0 : i32, i32
  }
  func.func @transform_6(%arg0: i32, %arg1: i32) -> (i32, i32) {
    %c0_i32 = arith.constant 0 : i32
    %c0_i32_0 = arith.constant 0 : i32
    %c0_i32_1 = arith.constant 0 : i32
    return %c0_i32, %c0_i32_0 : i32, i32
  }
  func.func @transform_7(%arg0: i32, %arg1: i32) -> (i32, i32) {
    %c0_i32 = arith.constant 0 : i32
    %c0_i32_0 = arith.constant 0 : i32
    %c0_i32_1 = arith.constant 0 : i32
    return %c0_i32, %c0_i32_0 : i32, i32
  }
  func.func @transform_8(%arg0: i32, %arg1: i32) -> (i32, i32, i32) {
    %c0_i32 = arith.constant 0 : i32
    %c0_i32_0 = arith.constant 0 : i32
    return %arg1, %arg0, %c0_i32 : i32, i32, i32
  }
}

</mosaic_0001>

<bundles_post_ra>
// kernel: edge_predictor.1
= control target key start
LH: loop header
LB: loop body
LE: loop exit
PB: predicated region body
PF: predicated region fallthrough
CT: control target
= control target key end

     0   :  { %s822_s29 = smov 0   ;;  %s824_s30 = smov 0   ;;  %s889_s0 = inlined_call_operand.vmem [shape: bf16[16,32], index: 0, kind: input, shape index: {}]   ;;  %s890_s1 = inlined_call_operand.vmem [shape: bf16[2,16,32], index: 1, kind: input, shape index: {}]   ;;  %s891_s2 = inlined_call_operand.vmem [shape: bf16[32,32], index: 2, kind: input, shape index: {}]   ;;  %s892_s3 = inlined_call_operand.vmem [shape: f32[1,32], index: 3, kind: input, shape index: {}]   ;;  %s893_s4 = inlined_call_operand.vmem [shape: bf16[32,32], index: 4, kind: input, shape index: {}]   ;;  %s894_s5 = inlined_call_operand.vmem [shape: f32[1,32], index: 5, kind: input, shape index: {}]   ;;  %s895_s6 = inlined_call_operand.vmem [shape: f32[1,32], index: 6, kind: input, shape index: {}]   ;;  %s896_s7 = inlined_call_operand.<no memory space> [shape: f32[1,1], index: 7, kind: input, shape index: {}]   ;;  %s897_s8 = inlined_call_operand.vmem [shape: f32[2,16,1], index: 8, kind: output, shape index: {}]  }
   0x1   :  { %v13_v0 = vstv %s896_s7  ;;  %s826_s9 = smov 0  }
   0x2   :  { %14 = vst [vmem:[#allocation3] sm:$0x1] %v13_v0 }
   0x3 LB: > { %s29_s7 = sadd.s32 1, %s764_s30  ;;  %p668_p0 = scmp.ge.s32.totalorder %s768_s9, 1  ;;  %s768_s9 = sphi %s826_s9, %s20_s9   ;;  %s764_s30 = sphi %s824_s30, %s899_s30   ;;  %s760_s29 = sphi %s822_s29, %s898_s29  }
   0x4   : > { %p30_p1 = scmp.ge.s32.totalorder %s29_s7, 2  ;;  %p296_p2 = scmp.lt.s32.totalorder %s768_s9, 3 }
   0x6   : > { %s901_s7 = smov (%p30_p1, %s29_s7), 0  ;;  %p297_p3 = pnand %p668_p0, %p296_p2 }
   0x7   : > { %p350_p4 = scmp.lt.s32.totalorder (!%p297_p3), %s760_s29, 1  ;;  %p673_p5 = scmp.ne.s32.totalorder (!%p297_p3), %s760_s29, 0 }
   0x8   : > { %300 = sbr.rel (%p297_p3) target bundleno = 584 (0x248), region = 52 }
   0xd   : > { %s351_s10 = scalar_select %p350_p4, %s760_s29, 1 }
   0xe   : > { %373 = sbr.rel (%p673_p5) target bundleno = 230 (0xe6), region = 56 }
   0xf   : > { %s688_s11 = sshll.u32 %s351_s10, 3  ;;  %s689_s12 = sshll.u32 %s351_s10, 4 }
  0x10   : > { %s843_s15 = scalar_lea.vmem %s890_s1, %s688_s11  ;;  %s848_s18 = scalar_lea.vmem %s897_s8, %s689_s12 }
  0x13   : > { %v740_v1 = vld [vmem:[%s891_s2 + $0x8] sm:$0xff]   ;;  %v770_v2 = vmov 0.0   ;;  %v741_v3 = vld [vmem:[%s891_s2] sm:$0xff]   ;;  %vm771_vm0 = vmmov 0   ;;  %vm404_vm1 = vcmask 261120  }
  0x14   : > { %696 = vmatprep.subr.bf16.mxu0 %v770_v2  ;;  %700 = vmatprep.mubr.msk.bf16.mxu0 %vm771_vm0, %v770_v2  ;;  %v742_v4 = vld [vmem:[%s889_s0] sm:$0xff]  }
  0x15   : > { %697 = vmatpush3.bf16.msra.mxu0 %v740_v1  ;;  %v674_v5 = vld [vmem:[%s892_s3] ss:$0 sm:$0xff] }
  0x16   : > { %698 = vmatprep.subr.bf16.mxu0 %v770_v2  ;;  %v679_v7 = vld [vmem:[%s894_s5] ss:$0 sm:$0xff] }
  0x19   : > { %699 = vmatpush3.bf16.msra.mxu0 %v741_v3 }
  0x1c   : > { %701 = vmatmul.mubr.msk.bf16.vlgmr.msra.gmra.mxu0 %vm404_vm1, %v742_v4 }
  0xdc   : > { %v442_v6 = vpop.f32.mrf.mxu0 }
  0xdd   : > { %v443_v8 = vadd.f32 %v674_v5, %v442_v6 }
  0xde   : > { %v702_v9 = vpop.f32.mrf.mxu0 }
  0xdf   : > { %v456_v10 = vadd.f32 %v679_v7, %v443_v8 }
  0xe0   : > { %v445_v11 = vpop.f32.mrf.mxu0 }
  0xe1   : > { %458 = vst.msk [vmem:[#allocation2] sm:$0xff] %vm404_vm1, %v456_v10  ;;  %v446_v12 = vadd.f32 %v674_v5, %v445_v11 }
  0xe2   : > { %v703_v13 = vpop.f32.mrf.mxu0 }
  0xe3   : > { %v457_v14 = vadd.f32 %v679_v7, %v446_v12 }
  0xe5   : > { %459 = vst.msk [vmem:[#allocation2 + $0x8] sm:$0xff] %vm404_vm1, %v457_v14 }
  0xe6 PF: > { %v743_v15 = vld [vmem:[%s893_s4 + $0x8] sm:$0xff]   ;;  %v772_v16 = vmov 0.0   ;;  %v744_v17 = vld [vmem:[%s893_s4] sm:$0xff]   ;;  %vm773_vm2 = vmmov 0   ;;  %vm483_vm3 = vcmask 261120   ;;  %vm558_vm4 = vcmask 7168  }
  0xe7   : > { %704 = vmatprep.subr.bf16.mxu0 %v772_v16  ;;  %708 = vmatprep.mubr.msk.bf16.mxu0 %vm773_vm2, %v772_v16  ;;  %v745_v18 = vld [vmem:[%s843_s15] sm:$0xff]   ;;  %v685_v34 = vld [vmem:[#allocation3] ss:$0 sm:$0xff] }
  0xe8   : > { %705 = vmatpush3.bf16.msra.mxu0 %v743_v15  ;;  %v528_v19 = vld [vmem:[#allocation2] sm:$0xff] }
  0xe9   : > { %706 = vmatprep.subr.bf16.mxu0 %v772_v16  ;;  %v684_v24 = vld [vmem:[%s895_s6] ss:$0 sm:$0xff] }
  0xec   : > { %707 = vmatpush3.bf16.msra.mxu0 %v744_v17  ;;  %v529_v23 = vld [vmem:[#allocation2 + $0x8] sm:$0xff] }
  0xef   : > { %709 = vmatmul.mubr.msk.bf16.vlgmr.msra.gmra.mxu0 %vm483_vm3, %v745_v18 }
 0x1af   : > { %v521_v20 = vpop.f32.mrf.mxu0 }
 0x1b0   : > { %v530_v21 = vadd.f32 %v528_v19, %v521_v20 }
 0x1b1   : > { %v710_v22 = vpop.f32.mrf.mxu0 }
 0x1b2   : > { %v532_v25 = vmax.f32 %v530_v21, 0.0 }
 0x1b3   : > { %v524_v26 = vpop.f32.mrf.mxu0 }
 0x1b4   : > { %v531_v27 = vadd.f32 %v529_v23, %v524_v26  ;;  %v541_v28 = vmul.f32 %v684_v24, %v532_v25 }
 0x1b5   : > { %v711_v29 = vpop.f32.mrf.mxu0 }
 0x1b6   : > { %v533_v30 = vmax.f32 %v531_v27, 0.0  ;;  %v543_v31 = vsel %vm483_vm3, %v541_v28, 0.0 }
 0x1b7   : > { %544 = vadd.xlane.f32.xlu0 %v543_v31 }
 0x1b8   : > { %v542_v32 = vmul.f32 %v684_v24, %v533_v30 }
 0x1ba   : > { %v546_v33 = vsel %vm483_vm3, %v542_v32, 0.0 }
 0x1bb   : > { %547 = vadd.xlane.f32.xlu0 %v546_v33 }
 0x240   : > { %v545_v35 = vpop.xlane.xlu0 %544 }
 0x241   : > { %v556_v36 = vadd.f32 %v685_v34, %v545_v35 }
 0x243   : > { %559 = vst.msk [vmem:[%s848_s18] sm:$0xff] %vm558_vm4, %v556_v36 }
 0x244   : > { %v548_v37 = vpop.xlane.xlu0 %547 }
 0x245   : > { %v557_v38 = vadd.f32 %v685_v34, %v548_v37 }
 0x247   : > { %560 = vst.msk [vmem:[%s848_s18 + $0x8] sm:$0xff] %vm558_vm4, %v557_v38 }
 0x248 PF: > { %s20_s9 = sadd.s32 1, %s768_s9   ;;  %s898_s29 = smov %s764_s30 }
 0x249   : > { %p17_p6 = scmp.ge.s32.totalorder %s20_s9, 4   ;;  %s899_s30 = smov %s901_s7 }
 0x24b   :  { %19 = sbr.rel (!%p17_p6) target bundleno = 3 (0x3), region = 89 }

</bundles_post_ra>
